<compile_context>
chip_gen: v7x
topology: tpu7x:2x2x1
jax: 0.10.0
libtpu: 0.0.40
codegen_flags: <defaults>
</compile_context>

<pallas_src>
import functools

import jax
import jax.numpy as jnp
from jax import lax
from jax.experimental import pallas as pl
from jax.experimental.pallas import tpu as pltpu

_LANE = 128
_SUBLANE = 8
_VREG_ELEMS = _LANE * _SUBLANE  # 1024


def _sc_loss_kernel(x_ref, y_ref, o_ref, num_acc, den_acc, *, valid_len, tile_n):
    """One grid step processes a lane-dense (B, tile_n) block of both inputs."""
    i = pl.program_id(0)

    @pl.when(i == 0)
    def _():
        num_acc[...] = jnp.zeros_like(num_acc)
        den_acc[...] = jnp.zeros_like(den_acc)

    x = x_ref[...].astype(jnp.float32)
    y = y_ref[...].astype(jnp.float32)
    d = y - x
    dd = d * d
    yy = y * y

    if valid_len % tile_n != 0:
        # The last block extends past the flattened length; Pallas pads it with
        # unspecified values, so zero those lanes out of the sums. (Cheap VPU
        # work; the kernel is HBM-bound.)
        lane = lax.broadcasted_iota(jnp.int32, x.shape, dimension=1)
        valid = (i * tile_n + lane) < valid_len
        dd = jnp.where(valid, dd, 0.0)
        yy = jnp.where(valid, yy, 0.0)

    # Per-batch partial sums for this tile (vreg-column VPU adds + one small
    # lane reduce), accumulated in f32.
    num_acc[...] += jnp.sum(dd, axis=-1, keepdims=True)
    den_acc[...] += jnp.sum(yy, axis=-1, keepdims=True)

    @pl.when(i == pl.num_programs(0) - 1)
    def _():
        o_ref[...] = (jnp.sqrt(num_acc[...]) / jnp.sqrt(den_acc[...])).astype(o_ref.dtype)


def spectral_convergence_loss(x_mag, y_mag, *, block_bytes=4 * 1024 * 1024):
    """Pallas implementation of SpectralConvergengeLoss.forward.

    Args:
      x_mag: (B, #frames, #freq_bins) predicted magnitude spectrogram (f32 or bf16).
      y_mag: (B, #frames, #freq_bins) ground-truth magnitude spectrogram.
      block_bytes: target HBM bytes per input block (controls tile size).
    Returns:
      (B,) float32 per-batch spectral-convergence loss, matching
      torch.norm(y - x, 'fro', dim=[-2, -1]) / torch.norm(y, 'fro', dim=[-2, -1]).
    """
    assert x_mag.shape == y_mag.shape, (x_mag.shape, y_mag.shape)
    assert x_mag.ndim >= 2
    B = x_mag.shape[0]
    L = 1
    for s in x_mag.shape[1:]:
        L *= s

    # Free metadata reshape: lane-dense flattened layout.
    x2 = x_mag.reshape(B, L)
    y2 = y_mag.reshape(B, L)

    itemsize = jnp.dtype(x_mag.dtype).itemsize
    # Tile of the flattened axis: multiple of 8*128, sized to ~block_bytes per
    # input block (2 inputs x 2 pipeline buffers stays well under scoped VMEM).
    tile_n = max(_VREG_ELEMS,
                 (block_bytes // (B * itemsize)) // _VREG_ELEMS * _VREG_ELEMS)
    if L <= tile_n:
        # Small input: a single block equal to the full array (always legal).
        tile_n = L
        n_tiles = 1
    else:
        n_tiles = pl.cdiv(L, tile_n)

    kernel = functools.partial(_sc_loss_kernel, valid_len=L, tile_n=tile_n)

    out = pl.pallas_call(
        kernel,
        out_shape=jax.ShapeDtypeStruct((B, 1), jnp.float32),
        grid_spec=pltpu.PrefetchScalarGridSpec(
            num_scalar_prefetch=0,
            grid=(n_tiles,),
            in_specs=[
                pl.BlockSpec((B, tile_n), lambda i: (0, i)),
                pl.BlockSpec((B, tile_n), lambda i: (0, i)),
            ],
            out_specs=pl.BlockSpec((B, 1), lambda i: (0, 0)),
            scratch_shapes=[
                pltpu.VMEM((B, 1), jnp.float32),  # numerator accumulator
                pltpu.VMEM((B, 1), jnp.float32),  # denominator accumulator
            ],
        ),
        compiler_params=pltpu.CompilerParams(
            dimension_semantics=("arbitrary",),       # reduction axis
            vmem_limit_bytes=32 * 1024 * 1024,        # fits v5e/v6e/v7x
        ),
    )(x2, y2)
    return out.reshape(B)


def _reference(x_mag, y_mag):
    x = x_mag.astype(jnp.float32)
    y = y_mag.astype(jnp.float32)
    num = jnp.sqrt(jnp.sum((y - x) ** 2, axis=(-2, -1)))
    den = jnp.sqrt(jnp.sum(y ** 2, axis=(-2, -1)))
    return num / den


if __name__ == "__main__":
    key = jax.random.PRNGKey(0)
    k1, k2, k3, k4 = jax.random.split(key, 4)

    # Case 1: tiny spectrogram -> single full-array block path.
    B, T, F = 2, 16, 16
    x1 = jnp.abs(jax.random.normal(k1, (B, T, F), dtype=jnp.float32))
    y1 = jnp.abs(jax.random.normal(k2, (B, T, F), dtype=jnp.float32))
    out1 = jax.block_until_ready(spectral_convergence_loss(x1, y1))
    ref1 = _reference(x1, y1)
    assert out1.shape == (B,)
    assert jnp.allclose(out1, ref1, rtol=1e-5, atol=1e-6), (out1, ref1)

    # Case 2: realistic odd freq-bin count (257) with a small block budget to
    # exercise the multi-tile pipeline and the masked remainder tile.
    B, T, F = 2, 16, 257
    x2 = jnp.abs(jax.random.normal(k3, (B, T, F), dtype=jnp.float32))
    y2 = jnp.abs(jax.random.normal(k4, (B, T, F), dtype=jnp.float32))
    out2 = jax.block_until_ready(
        spectral_convergence_loss(x2, y2, block_bytes=16 * 1024))
    ref2 = _reference(x2, y2)
    assert out2.shape == (B,)
    assert jnp.allclose(out2, ref2, rtol=1e-5, atol=1e-6), (out2, ref2)

    print("KERNEL_OK")
</pallas_src>

<mosaic_0001>
module attributes {stable_mosaic.version = 11 : i64} {
  func.func @_sc_loss_kernel(%arg0: i32, %arg1: memref<2x256xf32, #tpu.memory_space<vmem>>, %arg2: memref<2x256xf32, #tpu.memory_space<vmem>>, %arg3: memref<2x1xf32, #tpu.memory_space<vmem>>, %arg4: memref<2x1xf32, #tpu.memory_space<vmem>>, %arg5: memref<2x1xf32, #tpu.memory_space<vmem>>) attributes {dimension_semantics = [#tpu.dimension_semantics<arbitrary>], iteration_bounds = array<i64: 1>, scalar_prefetch = 0 : i64, scratch_operands = 2 : i64, tpu.core_type = #tpu.core_type<tc>, window_params = [{transform_indices = @transform_0, window_bounds = array<i64: 2, 256>}, {transform_indices = @transform_1, window_bounds = array<i64: 2, 256>}, {pipeline_mode = #tpu.pipeline_mode<synchronous>, transform_indices = @transform_2, window_bounds = array<i64: 2, 1>}]} {
    %c0_i32 = arith.constant 0 : i32
    %0 = arith.cmpi eq, %arg0, %c0_i32 : i32
    %1 = arith.extui %0 : i1 to i32
    %c0_i32_0 = arith.constant 0 : i32
    %2 = arith.cmpi ne, %1, %c0_i32_0 : i32
    scf.if %2 {
      %cst_15 = arith.constant 0.000000e+00 : f32
      %21 = vector.broadcast %cst_15 : f32 to vector<2x1xf32>
      %c0_16 = arith.constant 0 : index
      %c0_17 = arith.constant 0 : index
      %22 = vector.load %arg4[%c0_16, %c0_17] : memref<2x1xf32, #tpu.memory_space<vmem>>, vector<2x1xf32>
      tpu.vector_store %arg4[%c0_16, %c0_17], %21 {strides = array<i32>} : memref<2x1xf32, #tpu.memory_space<vmem>>, vector<2x1xf32>,
      %cst_18 = arith.constant 0.000000e+00 : f32
      %23 = vector.broadcast %cst_18 : f32 to vector<2x1xf32>
      %c0_19 = arith.constant 0 : index
      %c0_20 = arith.constant 0 : index
      %24 = vector.load %arg5[%c0_19, %c0_20] : memref<2x1xf32, #tpu.memory_space<vmem>>, vector<2x1xf32>
      tpu.vector_store %arg5[%c0_19, %c0_20], %23 {strides = array<i32>} : memref<2x1xf32, #tpu.memory_space<vmem>>, vector<2x1xf32>,
    } else {
    }
    %c0 = arith.constant 0 : index
    %c0_1 = arith.constant 0 : index
    %3 = vector.load %arg1[%c0, %c0_1] : memref<2x256xf32, #tpu.memory_space<vmem>>, vector<2x256xf32>
    %c0_2 = arith.constant 0 : index
    %c0_3 = arith.constant 0 : index
    %4 = vector.load %arg2[%c0_2, %c0_3] : memref<2x256xf32, #tpu.memory_space<vmem>>, vector<2x256xf32>
    %5 = arith.subf %4, %3 : vector<2x256xf32>
    %6 = arith.mulf %5, %5 : vector<2x256xf32>
    %7 = arith.mulf %4, %4 : vector<2x256xf32>
    %c0_4 = arith.constant 0 : index
    %c0_5 = arith.constant 0 : index
    %8 = vector.load %arg4[%c0_4, %c0_5] : memref<2x1xf32, #tpu.memory_space<vmem>>, vector<2x1xf32>
    %cst = arith.constant dense<0.000000e+00> : vector<2xf32>
    %9 = vector.multi_reduction <add>, %6, %cst [1] : vector<2x256xf32> to vector<2xf32>
    %10 = vector.shape_cast %9 : vector<2xf32> to vector<2x1xf32>
    %11 = arith.addf %8, %10 : vector<2x1xf32>
    %c0_6 = arith.constant 0 : index
    %c0_7 = arith.constant 0 : index
    %12 = vector.load %arg4[%c0_6, %c0_7] : memref<2x1xf32, #tpu.memory_space<vmem>>, vector<2x1xf32>
    tpu.vector_store %arg4[%c0_6, %c0_7], %11 {strides = array<i32>} : memref<2x1xf32, #tpu.memory_space<vmem>>, vector<2x1xf32>,
    %c0_8 = arith.constant 0 : index
    %c0_9 = arith.constant 0 : index
    %13 = vector.load %arg5[%c0_8, %c0_9] : memref<2x1xf32, #tpu.memory_space<vmem>>, vector<2x1xf32>
    %cst_10 = arith.constant dense<0.000000e+00> : vector<2xf32>
    %14 = vector.multi_reduction <add>, %7, %cst_10 [1] : vector<2x256xf32> to vector<2xf32>
    %15 = vector.shape_cast %14 : vector<2xf32> to vector<2x1xf32>
    %16 = arith.addf %13, %15 : vector<2x1xf32>
    %c0_11 = arith.constant 0 : index
    %c0_12 = arith.constant 0 : index
    %17 = vector.load %arg5[%c0_11, %c0_12] : memref<2x1xf32, #tpu.memory_space<vmem>>, vector<2x1xf32>
    tpu.vector_store %arg5[%c0_11, %c0_12], %16 {strides = array<i32>} : memref<2x1xf32, #tpu.memory_space<vmem>>, vector<2x1xf32>,
    %c0_i32_13 = arith.constant 0 : i32
    %18 = arith.cmpi eq, %arg0, %c0_i32_13 : i32
    %19 = arith.extui %18 : i1 to i32
    %c0_i32_14 = arith.constant 0 : i32
    %20 = arith.cmpi ne, %19, %c0_i32_14 : i32
    scf.if %20 {
      %c0_15 = arith.constant 0 : index
      %c0_16 = arith.constant 0 : index
      %21 = vector.load %arg4[%c0_15, %c0_16] : memref<2x1xf32, #tpu.memory_space<vmem>>, vector<2x1xf32>
      %22 = math.sqrt %21 : vector<2x1xf32>
      %c0_17 = arith.constant 0 : index
      %c0_18 = arith.constant 0 : index
      %23 = vector.load %arg5[%c0_17, %c0_18] : memref<2x1xf32, #tpu.memory_space<vmem>>, vector<2x1xf32>
      %24 = math.sqrt %23 : vector<2x1xf32>
      %25 = arith.divf %22, %24 : vector<2x1xf32>
      %c0_19 = arith.constant 0 : index
      %c0_20 = arith.constant 0 : index
      %26 = vector.load %arg3[%c0_19, %c0_20] : memref<2x1xf32, #tpu.memory_space<vmem>>, vector<2x1xf32>
      tpu.vector_store %arg3[%c0_19, %c0_20], %25 {strides = array<i32>} : memref<2x1xf32, #tpu.memory_space<vmem>>, vector<2x1xf32>,
    } else {
    }
    return
  }
  func.func @transform_0(%arg0: i32) -> (i32, i32) {
    %c0_i32 = arith.constant 0 : i32
    %c0_i32_0 = arith.constant 0 : i32
    return %c0_i32, %arg0 : i32, i32
  }
  func.func @transform_1(%arg0: i32) -> (i32, i32) {
    %c0_i32 = arith.constant 0 : i32
    %c0_i32_0 = arith.constant 0 : i32
    return %c0_i32, %arg0 : i32, i32
  }
  func.func @transform_2(%arg0: i32) -> (i32, i32) {
    %c0_i32 = arith.constant 0 : i32
    %c0_i32_0 = arith.constant 0 : i32
    %c0_i32_1 = arith.constant 0 : i32
    return %c0_i32, %c0_i32_0 : i32, i32
  }
}

</mosaic_0001>

<bundles_post_ra>
// kernel: tpu_custom_call.1
= control target key start
LH: loop header
LB: loop body
LE: loop exit
PB: predicated region body
PF: predicated region fallthrough
CT: control target
= control target key end

     0   :  { %7 = vsyncpa [#allocation5], 0  ;;  %s224_s0 = inlined_call_operand.hbm [shape: f32[2,256], index: 0, kind: input, shape index: {}]   ;;  %s225_s1 = inlined_call_operand.hbm [shape: f32[2,256], index: 1, kind: input, shape index: {}]   ;;  %s226_s2 = inlined_call_operand.vmem [shape: f32[2,1], index: 2, kind: output, shape index: {}]  }
   0x1   :  { %8 = vsyncpa [#allocation7], 0  ;;  %s173_s9 = smov [#allocation4]   ;;  %s174_s11 = smov [#allocation6]  }
   0x2   :  { %s15_s10 = sshll.u32 %s173_s9, 4  ;;  %s25_s12 = sshll.u32 %s174_s11, 4  ;;  %s16_s10 = int_to_ptr.vmem [resolvable:$true] %s15_s10  ;;  %s26_s12 = int_to_ptr.vmem [resolvable:$true] %s25_s12 }
   0x3   :  { %s125_s15 = scalar_lea.hbm %s224_s0, 64 }
   0x4   :  { %p126_p0 = scmp.ne.s32.totalorder %s224_s0, %s125_s15  ;;  %p129_p1 = scmp.lt.u32.totalorder %s125_s15, %s224_s0 }
   0x6   :  { %p131_p2 = pnand %p129_p1, %p126_p0 }
   0x8   :  { %134 = shalt.err (!%p131_p2)
}
   0x9   :  { %s135_s20 = scalar_lea.vmem %s16_s10, 64  ;;  %p140_p4 = scmp.lt.s32.totalorder %s16_s10, %s16_s10 }
   0xa   :  { %p136_p3 = scmp.ne.s32.totalorder %s16_s10, %s135_s20  ;;  %p141_p5 = scmp.lt.s32.totalorder %s135_s20, %s135_s20 }
   0xc   :  { %p142_p6 = por %p141_p5, %p140_p4 }
   0xe   :  { %p143_p7 = pnand %p142_p6, %p136_p3 }
  0x10   :  { %146 = shalt.err (!%p143_p7)
}
  0x11   :  { %18 = dma.hbm_to_vmem [thread:$0]  %s224_s0, 64, %s16_s10, [#allocation5]  }
  0x12   :  { %s147_s25 = scalar_lea.hbm %s225_s1, 64 }
  0x13   :  { %p148_p8 = scmp.ne.s32.totalorder %s225_s1, %s147_s25  ;;  %p151_p9 = scmp.lt.u32.totalorder %s147_s25, %s225_s1 }
  0x15   :  { %p153_p10 = pnand %p151_p9, %p148_p8 }
  0x17   :  { %156 = shalt.err (!%p153_p10)
}
  0x18   :  { %s157_s30 = scalar_lea.vmem %s26_s12, 64  ;;  %p162_p12 = scmp.lt.s32.totalorder %s26_s12, %s26_s12 }
  0x19   :  { %p158_p11 = scmp.ne.s32.totalorder %s26_s12, %s157_s30  ;;  %p163_p13 = scmp.lt.s32.totalorder %s157_s30, %s157_s30 }
  0x1b   :  { %p164_p0 = por %p163_p13, %p162_p12 }
  0x1d   :  { %p165_p1 = pnand %p164_p0, %p158_p11 }
  0x1f   :  { %168 = shalt.err (!%p165_p1)
}
  0x20   :  { %28 = dma.hbm_to_vmem [thread:$0]  %s225_s1, 64, %s26_s12, [#allocation7]  }
  0x21   :  { %169 = dma.done.wait [#allocation5], 64  }
  0x22   :  { %170 = vsyncadd [#allocation5], 4294967232 }
  0x23   :  { %171 = dma.done.wait [#allocation7], 64  }
  0x24   :  { %172 = vsyncadd [#allocation7], 4294967232  ;;  %v52_v0 = vlaneseq  ;;  %vm39_vm0 = vcmask 1024   ;;  %v175_v1 = vmov 1983009808   ;;  %v176_v4 = vmov 0.0  }
  0x25   :  { %v50_v2 = vunpack.c.l.s4 %v175_v1  ;;  %41 = vst.msk [vmem:[#allocation3] sm:$0x3] %vm39_vm0, %v176_v4  ;;  %40 = vst.msk [vmem:[#allocation2] sm:$0x3] %vm39_vm0, %v176_v4  ;;  %v43_v7 = vld [vmem:[#allocation6] sm:$0xf] }
  0x26   :  { %v53_v3 = vshrl.u32 %v52_v0, 7  ;;  %v42_v8 = vld [vmem:[#allocation4] sm:$0xf]  ;;  %v46_v9 = vmul.f32 %v43_v7, %v43_v7  ;;  %vm59_vm1 = vcmask 1041408  }
  0x27   :  { %v51_v5 = vunpack.c.0.s8 %v50_v2  ;;  %v44_v10 = vsub.f32 %v43_v7, %v42_v8 }
  0x29   :  { %v54_v6 = vsub.s32 %v51_v5, %v53_v3  ;;  %v45_v12 = vmul.f32 %v44_v10, %v44_v10 }
  0x2b   :  { %v76_v11 = vrot.slane %v46_v9, %v54_v6  ;;  %v55_v15 = vrot.slane %v45_v12, %v54_v6 }
  0x2c   :  { %v68_v22 = vld [vmem:[#allocation3] sm:$0x3]  ;;  %v47_v25 = vld [vmem:[#allocation2] sm:$0x3] }
  0x2d   :  { %v77_v13 = vcombine.high %v76_v11, %v76_v11  ;;  %v80_v14 = vsel %vm59_vm1, %v76_v11, 0.0  ;;  %v56_v17 = vcombine.high %v55_v15, %v55_v15  ;;  %v60_v18 = vsel %vm59_vm1, %v55_v15, 0.0 }
  0x2f   :  { %v81_v16 = vsel %vm59_vm1, %v77_v13, 0.0  ;;  %v61_v20 = vsel %vm59_vm1, %v56_v17, 0.0 }
  0x30   :  { %v82_v19 = vadd.f32 %v81_v16, %v80_v14  ;;  %v62_v21 = vadd.f32 %v61_v20, %v60_v18 }
  0x32   :  { %83 = vadd.xlane.f32.xlu0 %v82_v19 }
  0x36   :  { %63 = vadd.xlane.f32.xlu0 %v62_v21 }
  0xbf   :  { %v84_v23 = vpop.xlane.xlu0 %83 }
  0xc0   :  { %v85_v24 = vadd.f32 %v84_v23, %v68_v22 }
  0xc2   :  { %86 = vst.msk [vmem:[#allocation3] sm:$0x3] %vm39_vm0, %v85_v24 }
  0xc3   :  { %v64_v26 = vpop.xlane.xlu0 %63 }
  0xc4   :  { %v65_v27 = vadd.f32 %v64_v26, %v47_v25 }
  0xc6   :  { %67 = vst.msk [vmem:[#allocation2] sm:$0x3] %vm39_vm0, %v65_v27 }
  0xc9   :  { %v98_v28 = vld [vmem:[#allocation3] sm:$0x3] }
  0xca   :  { %119 = vrsqrt.f32 %v98_v28  ;;  %vm101_vm2 = vcmp.eq.f32.partialorder %v98_v28, inf  ;;  %v104_v32 = vand.u32 2147483648, %v98_v28  ;;  %vm103_vm3 = vcmp.eq.f32.partialorder %v98_v28, 0.0 }
  0xcd   :  { %v90_v29 = vld [vmem:[#allocation2] sm:$0x3] }
  0xce   :  { %121 = vrsqrt.f32 %v90_v29  ;;  %vm93_vm4 = vcmp.eq.f32.partialorder %v90_v29, inf  ;;  %v96_v38 = vand.u32 2147483648, %v90_v29  ;;  %vm95_vm5 = vcmp.eq.f32.partialorder %v90_v29, 0.0 }
  0xd4   :  { %v120_v30 = vpop.eup %119 }
  0xd5   :  { %v100_v31 = vmul.f32 %v120_v30, %v98_v28 }
  0xd7   :  { %v102_v33 = vsel %vm101_vm2, %v98_v28, %v100_v31 }
  0xd8   :  { %v105_v34 = vsel %vm103_vm3, %v104_v32, %v102_v33  ;;  %v122_v35 = vpop.eup %121 }
  0xd9   :  { %123 = vrcp.f32 %v105_v34  ;;  %v92_v36 = vmul.f32 %v122_v35, %v90_v29 }
  0xdb   :  { %v94_v37 = vsel %vm93_vm4, %v90_v29, %v92_v36 }
  0xdc   :  { %v97_v40 = vsel %vm95_vm5, %v96_v38, %v94_v37 }
  0xe3   :  { %v124_v39 = vpop.eup %123 }
  0xe4   :  { %v107_v41 = vmul.f32 %v124_v39, %v97_v40 }
  0xe6   :  { %108 = vst.msk [vmem:[%s226_s2] sm:$0x3] %vm39_vm0, %v107_v41 }
  0xe7   :  { %113 = vsyncpa [#allocation5], 1 }
  0xe8   :  { %114 = vsyncpa [#allocation7], 1 }

</bundles_post_ra>
